<compile_context>
chip_gen: v5e
topology: v5e:2x2
jax: 0.10.0
libtpu: 0.0.40
codegen_flags: <defaults>
</compile_context>

<pallas_src>
import functools
import math

import jax
import jax.numpy as jnp
from jax import lax
from jax.experimental import pallas as pl
from jax.experimental.pallas import tpu as pltpu

MATMUL_DTYPE = jnp.bfloat16    # MXU operand dtype; accumulation is always f32
NEG_INF = -1e30                # finite "minus infinity" for masking
TILE_Q = 256                   # rows of Q per grid step (fills 256-wide MXU)
TILE_K = 256                   # K/V slice width of the in-kernel reduction loop
assert TILE_Q == TILE_K, "triangular loop bounds below assume TILE_Q == TILE_K"

KV_RESIDENT_MAX_BYTES = 48 * 1024 * 1024   # v7x-safe cap (64 MiB physical VMEM)


def _round_up(x, m):
    return ((x + m - 1) // m) * m


def _keep_mask(idx, seed, threshold):
    """Cheap counter-based hash -> boolean keep mask via integer threshold.
    ~2-3 mix rounds, int32 ops only (masked arithmetic shifts == logical)."""
    h = idx * (-1640531527) + seed
    h = h ^ ((h >> 15) & 0x1FFFF)
    h = h * (-2048144789)
    h = h ^ ((h >> 13) & 0x7FFFF)
    return (h & 0x7FFFFF) >= threshold


# ----------------------------------------------------------------------------
# Kernel 1: fused QKV projection (single concatenated weight, one MXU matmul)
# ----------------------------------------------------------------------------
def qkv_proj_kernel(x_ref, w_ref, q_ref, k_ref, v_ref, *, d_pad):
    # x / w already in the MXU operand dtype; 1/sqrt(d_out) folded into W_q.
    acc = jnp.dot(x_ref[...], w_ref[...],
                  preferred_element_type=jnp.float32)      # (row_tile, 3*d_pad)
    q_ref[...] = acc[:, :d_pad].astype(q_ref.dtype)
    k_ref[...] = acc[:, d_pad:2 * d_pad].astype(k_ref.dtype)
    v_ref[...] = acc[:, 2 * d_pad:].astype(v_ref.dtype)


def _qkv_projection(x_flat, w_cat, *, d_pad):
    rows, d_in = x_flat.shape
    row_tile = 512 if rows % 512 == 0 else 256              # rows is a mult of 256
    out_sds = jax.ShapeDtypeStruct((rows, d_pad), MATMUL_DTYPE)
    proj_vmem = 2 * 2 * (row_tile * d_in + d_in * 3 * d_pad
                         + 3 * row_tile * d_pad) + (4 << 20)
    return pl.pallas_call(
        functools.partial(qkv_proj_kernel, d_pad=d_pad),
        out_shape=(out_sds, out_sds, out_sds),
        grid=(rows // row_tile,),
        in_specs=[
            pl.BlockSpec((row_tile, d_in), lambda r: (r, 0)),
            pl.BlockSpec((d_in, 3 * d_pad), lambda r: (0, 0)),
        ],
        out_specs=(
            pl.BlockSpec((row_tile, d_pad), lambda r: (r, 0)),
            pl.BlockSpec((row_tile, d_pad), lambda r: (r, 0)),
            pl.BlockSpec((row_tile, d_pad), lambda r: (r, 0)),
        ),
        compiler_params=pltpu.CompilerParams(
            dimension_semantics=("parallel",),
            vmem_limit_bytes=min(48 << 20, max(32 << 20, proj_vmem))),
    )(x_flat, w_cat)


# ----------------------------------------------------------------------------
# Kernel 2: flash-style causal attention, K/V resident in VMEM per batch
# ----------------------------------------------------------------------------
def flash_attn_kernel(seed_ref, q_ref, k_ref, v_ref, o_ref,
                      m_scr, l_scr, acc_scr, *,
                      seq_len, t_pad, tq, tk, dropout_p, apply_dropout):
    b = pl.program_id(0)
    qi = pl.program_id(1)

    m_scr[...] = jnp.full_like(m_scr, NEG_INF)
    l_scr[...] = jnp.zeros_like(l_scr)
    acc_scr[...] = jnp.zeros_like(acc_scr)

    q = q_ref[...]                                          # (tq, d_pad) bf16

    if apply_dropout:  # trace-time branch; eval mode skips everything below
        seed = seed_ref[0]
        threshold = int(dropout_p * (1 << 23))
        local_r = lax.broadcasted_iota(jnp.int32, (tq, tk), 0)
        local_c = lax.broadcasted_iota(jnp.int32, (tq, tk), 1)
        # int32 keying only; overflow for very long sequences merely perturbs
        # the RNG stream, never numerical stability.
        drop_base = (b * t_pad + qi * tq + local_r) * t_pad + local_c

    def make_step(masked):
        def step(kv, carry):
            col0 = pl.multiple_of(kv * tk, tk)
            k_blk = k_ref[pl.ds(col0, tk), :]                # resident VMEM slice
            v_blk = v_ref[pl.ds(col0, tk), :]
            # QK^T: contract last dims directly (no materialized transpose).
            s = lax.dot_general(q, k_blk, (((1,), (1,)), ((), ())),
                                preferred_element_type=jnp.float32)   # (tq, tk)
            if masked:  # diagonal / length-edge tiles only
                rows = qi * tq + lax.broadcasted_iota(jnp.int32, (tq, tk), 0)
                cols = kv * tk + lax.broadcasted_iota(jnp.int32, (tq, tk), 1)
                valid = (cols <= rows) & (cols < seq_len)
                s = jnp.where(valid, s, NEG_INF)

            m_prev = m_scr[...]
            m_new = jnp.maximum(m_prev, jnp.max(s, axis=-1, keepdims=True))
            alpha = jnp.exp(m_prev - m_new)
            p = jnp.exp(s - m_new)                           # (tq, tk) f32

            # Softmax denominator uses the UNdropped probabilities.
            l_scr[...] = alpha * l_scr[...] + jnp.sum(p, axis=-1, keepdims=True)

            if apply_dropout:
                keep = _keep_mask(drop_base + kv * tk, seed, threshold)
                p = jnp.where(keep, p, 0.0)

            pv = jnp.dot(p.astype(v_blk.dtype), v_blk,
                         preferred_element_type=jnp.float32)  # (tq, d_pad)
            acc_scr[...] = alpha * acc_scr[...] + pv
            m_scr[...] = m_new
            return carry
        return step

    # Triangular KV loop: only tiles at/below the diagonal and within seq_len.
    n_kv = jnp.minimum(qi + 1, (seq_len + tk - 1) // tk)     # tiles to visit
    n_interior = jnp.minimum(qi, seq_len // tk)              # mask-free tiles
    lax.fori_loop(0, n_interior, make_step(False), 0)
    lax.fori_loop(n_interior, n_kv, make_step(True), 0)

    # Single fused per-row rescale: dropout 1/(1-p) and softmax 1/l together;
    # reciprocal rides the EUP slot.
    inv_keep = 1.0 / (1.0 - dropout_p) if apply_dropout else 1.0
    inv_l = pl.reciprocal(l_scr[...], approx=True)
    o_ref[...] = (acc_scr[...] * (inv_keep * inv_l)).astype(o_ref.dtype)


def _flash_attention(q, k, v, *, seq_len, seed, dropout_p, apply_dropout):
    B, t_pad, d_pad = q.shape
    n_q = t_pad // TILE_Q
    seed_arr = jnp.array([seed], dtype=jnp.int32)

    # VMEM budget for the K/V-resident plan (double-buffered bf16 blocks).
    kv_vmem = 2 * 2 * t_pad * d_pad * 2                      # K + V resident
    qo_vmem = 2 * 2 * TILE_Q * d_pad * 2                     # Q block + O block
    scr_vmem = TILE_Q * d_pad * 4 + 2 * TILE_Q * 4
    vmem_needed = kv_vmem + qo_vmem + scr_vmem + (6 << 20)   # headroom for temps
    assert vmem_needed <= KV_RESIDENT_MAX_BYTES, (
        "K/V-resident attention exceeds the v7x-safe VMEM budget for this "
        "sequence length; fall back to streaming KV tiles (TILE_K >= 512).")
    vmem_limit = min(max(32 << 20, vmem_needed), KV_RESIDENT_MAX_BYTES)

    kernel = functools.partial(
        flash_attn_kernel, seq_len=seq_len, t_pad=t_pad, tq=TILE_Q, tk=TILE_K,
        dropout_p=float(dropout_p), apply_dropout=apply_dropout)

    return pl.pallas_call(
        kernel,
        out_shape=jax.ShapeDtypeStruct((B, t_pad, d_pad), MATMUL_DTYPE),
        grid_spec=pltpu.PrefetchScalarGridSpec(
            num_scalar_prefetch=1,
            grid=(B, n_q),
            in_specs=[
                # Q tile streams per (b, qi)
                pl.BlockSpec((None, TILE_Q, d_pad), lambda b, qi, seed: (b, qi, 0)),
                # K / V: full padded sequence, index constant across qi ->
                # DMA'd once per batch element and kept resident in VMEM.
                pl.BlockSpec((None, t_pad, d_pad), lambda b, qi, seed: (b, 0, 0)),
                pl.BlockSpec((None, t_pad, d_pad), lambda b, qi, seed: (b, 0, 0)),
            ],
            out_specs=pl.BlockSpec((None, TILE_Q, d_pad),
                                   lambda b, qi, seed: (b, qi, 0)),
            scratch_shapes=[
                pltpu.VMEM((TILE_Q, 1), jnp.float32),        # running max m
                pltpu.VMEM((TILE_Q, 1), jnp.float32),        # running denom l
                pltpu.VMEM((TILE_Q, d_pad), jnp.float32),    # running numerator
            ]),
        compiler_params=pltpu.CompilerParams(
            dimension_semantics=("parallel", "parallel"),
            vmem_limit_bytes=vmem_limit),
    )(seed_arr, q, k, v)


# ----------------------------------------------------------------------------
# Wrapper: matches CausalAttention.forward (qkv_bias=False)
# ----------------------------------------------------------------------------
def causal_attention(x, w_query, w_key, w_value, *, seed=0,
                     dropout_p=0.1, training=True, context_length=None):
    """x: (B, T, d_in); w_*: (d_in, d_out) so the kernel computes x @ W
    (== PyTorch Linear with weight W.T). Returns (B, T, d_out)."""
    B, T, d_in = x.shape
    d_out = w_query.shape[1]
    if context_length is not None:
        assert context_length == T, "Context length does not match the number of tokens."
    scale = 1.0 / math.sqrt(d_out)                 # keys.shape[-1] ** 0.5
    apply_dropout = bool(training) and float(dropout_p) > 0.0

    t_pad = _round_up(T, TILE_Q)
    d_pad = _round_up(d_out, 128)                  # lane-dense tiles

    # Pad + pre-cast MXU operands (casts hoisted out of the grid loops).
    x_p = jnp.zeros((B, t_pad, d_in), MATMUL_DTYPE).at[:, :T, :].set(
        x.astype(MATMUL_DTYPE))

    def pad_w(w, s=1.0):
        return jnp.zeros((d_in, d_pad), jnp.float32).at[:, :d_out].set(
            w.astype(jnp.float32) * s)

    # Concatenated Q|K|V weight (scale folded into W_q — tiny wrapper-side op).
    w_cat = jnp.concatenate(
        [pad_w(w_query, scale), pad_w(w_key), pad_w(w_value)],
        axis=1).astype(MATMUL_DTYPE)                          # (d_in, 3*d_pad)

    q_f, k_f, v_f = _qkv_projection(x_p.reshape(B * t_pad, d_in), w_cat,
                                    d_pad=d_pad)
    q = q_f.reshape(B, t_pad, d_pad)
    k = k_f.reshape(B, t_pad, d_pad)
    v = v_f.reshape(B, t_pad, d_pad)

    out_pad = _flash_attention(q, k, v, seq_len=T, seed=seed,
                               dropout_p=dropout_p, apply_dropout=apply_dropout)

    return out_pad[:, :T, :d_out].astype(x.dtype)


if __name__ == "__main__":
    # Shapes implied by the module's surrounding script:
    #   inputs = rand(6, 3); batch = stack((inputs, inputs)) -> (2, 6, 3)
    #   CausalAttention(in_dim=3, out_dim=2, context_length=6)
    B, T, d_in, d_out = 2, 6, 3, 2

    key = jax.random.PRNGKey(0)
    kx, kq, kk, kv = jax.random.split(key, 4)

    x_single = jax.random.uniform(kx, (T, d_in), dtype=jnp.float32)
    x = jnp.stack([x_single, x_single], axis=0)               # (2, 6, 3)

    # Deterministic init mimicking nn.Linear: U(-1/sqrt(in_dim), 1/sqrt(in_dim)).
    bound = 1.0 / math.sqrt(d_in)
    w_query = jax.random.uniform(kq, (d_in, d_out), jnp.float32, -bound, bound)
    w_key = jax.random.uniform(kk, (d_in, d_out), jnp.float32, -bound, bound)
    w_value = jax.random.uniform(kv, (d_in, d_out), jnp.float32, -bound, bound)

    out = causal_attention(x, w_query, w_key, w_value,
                           seed=0, dropout_p=0.1, training=True,
                           context_length=T)
    jax.block_until_ready(out)
    assert out.shape == (B, T, d_out)
    print("KERNEL_OK")
</pallas_src>

<mosaic_0001>
module attributes {stable_mosaic.version = 11 : i64} {
  func.func @qkv_proj_kernel(%arg0: i32, %arg1: memref<512x3xbf16, #tpu.memory_space<vmem>>, %arg2: memref<3x384xbf16, #tpu.memory_space<vmem>>, %arg3: memref<512x128xbf16, #tpu.memory_space<vmem>>, %arg4: memref<512x128xbf16, #tpu.memory_space<vmem>>, %arg5: memref<512x128xbf16, #tpu.memory_space<vmem>>) attributes {dimension_semantics = [#tpu.dimension_semantics<parallel>], iteration_bounds = array<i64: 1>, scalar_prefetch = 0 : i64, scratch_operands = 0 : i64, tpu.core_type = #tpu.core_type<tc>, window_params = [{transform_indices = @transform_0, window_bounds = array<i64: 512, 3>}, {pipeline_mode = #tpu.pipeline_mode<synchronous>, transform_indices = @transform_1, window_bounds = array<i64: 3, 384>}, {transform_indices = @transform_2, window_bounds = array<i64: 512, 128>}, {transform_indices = @transform_3, window_bounds = array<i64: 512, 128>}, {transform_indices = @transform_4, window_bounds = array<i64: 512, 128>}]} {
    %c0 = arith.constant 0 : index
    %c0_0 = arith.constant 0 : index
    %0 = vector.load %arg1[%c0, %c0_0] : memref<512x3xbf16, #tpu.memory_space<vmem>>, vector<512x3xbf16>
    %c0_1 = arith.constant 0 : index
    %c0_2 = arith.constant 0 : index
    %1 = vector.load %arg2[%c0_1, %c0_2] : memref<3x384xbf16, #tpu.memory_space<vmem>>, vector<3x384xbf16>
    %cst = arith.constant dense<0.000000e+00> : vector<512x384xf32>
    %2 = tpu.matmul %0, %1, %cst {dimension_numbers = #tpu.dot_dimension_numbers<[1], [0], [0], [1], [0, 0, 1, 1], [], []>} : vector<512x3xbf16>, vector<3x384xbf16>, vector<512x384xf32> -> vector<512x384xf32>
    %3 = vector.extract_strided_slice %2 {offsets = [0, 0], sizes = [512, 128], strides = [1, 1]} : vector<512x384xf32> to vector<512x128xf32>
    %4 = arith.truncf %3 : vector<512x128xf32> to vector<512x128xbf16>
    %c0_3 = arith.constant 0 : index
    %c0_4 = arith.constant 0 : index
    %5 = vector.load %arg3[%c0_3, %c0_4] : memref<512x128xbf16, #tpu.memory_space<vmem>>, vector<512x128xbf16>
    tpu.vector_store %arg3[%c0_3, %c0_4], %4 {strides = array<i32>} : memref<512x128xbf16, #tpu.memory_space<vmem>>, vector<512x128xbf16>,
    %6 = vector.extract_strided_slice %2 {offsets = [0, 128], sizes = [512, 128], strides = [1, 1]} : vector<512x384xf32> to vector<512x128xf32>
    %7 = arith.truncf %6 : vector<512x128xf32> to vector<512x128xbf16>
    %c0_5 = arith.constant 0 : index
    %c0_6 = arith.constant 0 : index
    %8 = vector.load %arg4[%c0_5, %c0_6] : memref<512x128xbf16, #tpu.memory_space<vmem>>, vector<512x128xbf16>
    tpu.vector_store %arg4[%c0_5, %c0_6], %7 {strides = array<i32>} : memref<512x128xbf16, #tpu.memory_space<vmem>>, vector<512x128xbf16>,
    %9 = vector.extract_strided_slice %2 {offsets = [0, 256], sizes = [512, 128], strides = [1, 1]} : vector<512x384xf32> to vector<512x128xf32>
    %10 = arith.truncf %9 : vector<512x128xf32> to vector<512x128xbf16>
    %c0_7 = arith.constant 0 : index
    %c0_8 = arith.constant 0 : index
    %11 = vector.load %arg5[%c0_7, %c0_8] : memref<512x128xbf16, #tpu.memory_space<vmem>>, vector<512x128xbf16>
    tpu.vector_store %arg5[%c0_7, %c0_8], %10 {strides = array<i32>} : memref<512x128xbf16, #tpu.memory_space<vmem>>, vector<512x128xbf16>,
    return
  }
  func.func @transform_0(%arg0: i32) -> (i32, i32) {
    %c0_i32 = arith.constant 0 : i32
    %c0_i32_0 = arith.constant 0 : i32
    return %arg0, %c0_i32 : i32, i32
  }
  func.func @transform_1(%arg0: i32) -> (i32, i32) {
    %c0_i32 = arith.constant 0 : i32
    %c0_i32_0 = arith.constant 0 : i32
    %c0_i32_1 = arith.constant 0 : i32
    return %c0_i32, %c0_i32_0 : i32, i32
  }
  func.func @transform_2(%arg0: i32) -> (i32, i32) {
    %c0_i32 = arith.constant 0 : i32
    %c0_i32_0 = arith.constant 0 : i32
    return %arg0, %c0_i32 : i32, i32
  }
  func.func @transform_3(%arg0: i32) -> (i32, i32) {
    %c0_i32 = arith.constant 0 : i32
    %c0_i32_0 = arith.constant 0 : i32
    return %arg0, %c0_i32 : i32, i32
  }
  func.func @transform_4(%arg0: i32) -> (i32, i32) {
    %c0_i32 = arith.constant 0 : i32
    %c0_i32_0 = arith.constant 0 : i32
    return %arg0, %c0_i32 : i32, i32
  }
}

</mosaic_0001>

<bundles_post_ra>
// kernel: tpu_custom_call.1
= control target key start
LH: loop header
LB: loop body
LE: loop exit
PB: predicated region body
PF: predicated region fallthrough
CT: control target
= control target key end

     0   :  { %10 = vsyncpa [#allocation3], 0  ;;  %vm344_vm0 = vcmask 1040384   ;;  %s2487_s0 = inlined_call_operand.vmem [shape: bf16[512,3], index: 0, kind: input, shape index: {}]   ;;  %s2488_s1 = inlined_call_operand.vmem [shape: bf16[3,384], index: 1, kind: input, shape index: {}]   ;;  %s2489_s2 = inlined_call_operand.hbm [shape: bf16[512,128], index: 2, kind: output, shape index: {0}]   ;;  %s2490_s3 = inlined_call_operand.hbm [shape: bf16[512,128], index: 3, kind: output, shape index: {1}]   ;;  %s2491_s4 = inlined_call_operand.hbm [shape: bf16[512,128], index: 4, kind: output, shape index: {2}]  }
   0x1   :  { %v81_v0 = vld [vmem:[%s2488_s1] sm:$0x3f] }
   0x2   :  { %243 = vst [vmem:[#allocation1] ss:$4 sm:$0xff] %v81_v0 }
   0x3   :  { %11 = vsyncpa [#allocation5], 0  ;;  %vm345_vm1 = vcmask 1041408   ;;  %v2212_v1 = vmov 65535   ;;  %v1522_v10 = vld [vmem:[%s2487_s0] sm:$0xff]  ;;  %vm247_vm2 = vcmask 23552  }
   0x4   :  { %v346_v2 = vsel %vm344_vm0, 4294967295, %v2212_v1  ;;  %v2252_v11 = vld [vmem:[%s2487_s0 + $0xc0] sm:$0xff]  ;;  %v1523_v12 = vld [vmem:[%s2487_s0 + $0x8] sm:$0xff]  ;;  %v1524_v14 = vld [vmem:[%s2487_s0 + $0x10] sm:$0xff]  ;;  %s2214_s27 = smov [#allocation2]   ;;  %s1251_s5 = sshll.u32 %s2489_s2, 4  ;;  %s1252_s5 = int_to_ptr.hbm [resolvable:$true] %s1251_s5 }
   0x5   :  { %v347_v3 = vsel %vm345_vm1, %v346_v2, 0  ;;  %v2265_v13 = vld [vmem:[%s2487_s0 + $0xc8] sm:$0xff]  ;;  %v2278_v15 = vld [vmem:[%s2487_s0 + $0xd0] sm:$0xff]  ;;  %v1525_v16 = vld [vmem:[%s2487_s0 + $0x18] sm:$0xff]  ;;  %s1249_s28 = sshll.u32 %s2214_s27, 4  ;;  %s1264_s8 = sshll.u32 %s2490_s3, 4  ;;  %s1250_s28 = int_to_ptr.vmem [resolvable:$true] %s1249_s28  ;;  %s1265_s8 = int_to_ptr.hbm [resolvable:$true] %s1264_s8 }
   0x6   :  { %v2291_v17 = vld [vmem:[%s2487_s0 + $0xd8] sm:$0xff]  ;;  %v1526_v18 = vld [vmem:[%s2487_s0 + $0x20] sm:$0xff]  ;;  %v1527_v20 = vld [vmem:[%s2487_s0 + $0x28] sm:$0xff]  ;;  %s2215_s9 = smov [#allocation6]   ;;  %s1277_s2 = sshll.u32 %s2491_s4, 4  ;;  %s1278_s2 = int_to_ptr.hbm [resolvable:$true] %s1277_s2 }
   0x7   :  { %v2304_v19 = vld [vmem:[%s2487_s0 + $0xe0] sm:$0xff]  ;;  %v2317_v21 = vld [vmem:[%s2487_s0 + $0xe8] sm:$0xff]  ;;  %v1528_v22 = vld [vmem:[%s2487_s0 + $0x30] sm:$0xff]  ;;  %s1275_s10 = sshll.u32 %s2215_s9, 4  ;;  %s2216_s13 = smov 64   ;;  %s1276_s10 = int_to_ptr.vmem [resolvable:$true] %s1275_s10 }
   0x8   :  { %v2330_v23 = vld [vmem:[%s2487_s0 + $0xf0] sm:$0xff]  ;;  %v1529_v24 = vld [vmem:[%s2487_s0 + $0x38] sm:$0xff]  ;;  %v1530_v26 = vld [vmem:[%s2487_s0 + $0x40] sm:$0xff]  ;;  %s2217_s14 = smov 4  }
   0x9   :  { %v244_v4 = vld.sshfl [vmem:[#allocation1] sm:$0xff pattern:$0x73625140]  ;;  %v245_v5 = vld.sshfl [vmem:[#allocation1 + $0x8] sm:$0xff pattern:$0x73625140] }
   0xa   :  { %v348_v6 = vand.u32 %v347_v3, %v244_v4  ;;  %v350_v7 = vand.u32 %v347_v3, %v245_v5  ;;  %v246_v8 = vld.sshfl [vmem:[#allocation1 + $0x10] sm:$0xff pattern:$0x73625140]  ;;  %v2343_v25 = vld [vmem:[%s2487_s0 + $0xf8] sm:$0xff]  ;;  %v1531_v38 = vld [vmem:[%s2487_s0 + $0x48] sm:$0xff] }
   0xb   :  { %v352_v9 = vand.u32 %v347_v3, %v246_v8  ;;  %v1532_v51 = vld [vmem:[%s2487_s0 + $0x50] sm:$0xff]  ;;  %v1533_v0 = vld [vmem:[%s2487_s0 + $0x58] sm:$0xff] }
   0xc   :  { %361 = vmatpush.bf16.msra.mxu0 %v348_v6  ;;  %2127 = vmatpush.bf16.msra.mxu3 %v348_v6 }
   0xd   :  { %530 = vmatpush.bf16.msra.mxu1 %v350_v7  ;;  %699 = vmatpush.bf16.msra.mxu2 %v352_v9 }
   0xf   :  { %1426 = vmatmul.msk.bf16.vlgmr.msra.gmra.mxu0 %vm247_vm2, %v1522_v10  ;;  %1450 = vmatmul.msk.bf16.vlgmr.msra.gmra.mxu3 %vm247_vm2, %v2252_v11 }
  0x10   :  { %2128 = vmatpush.bf16.msrb.mxu3 %v350_v7  ;;  %1458 = vmatmul.msk.bf16.vlgmr.msra.gmra.mxu1 %vm247_vm2, %v1522_v10 }
  0x11   :  { %1490 = vmatmul.msk.bf16.vlgmr.msra.gmra.mxu2 %vm247_vm2, %v1522_v10 }
  0x14   :  { %2129 = vmatpush.bf16.msra.mxu3 %v352_v9 }
  0x1f   :  { %1427 = vmatmul.msk.bf16.gmra.mxu0 %vm247_vm2, %v1523_v12  ;;  %1451 = vmatmul.msk.bf16.gmra.mxu3 %vm247_vm2, %v2265_v13 }
  0x20   :  { %1459 = vmatmul.msk.bf16.gmra.mxu1 %vm247_vm2, %v1523_v12 }
  0x21   :  { %1491 = vmatmul.msk.bf16.gmra.mxu2 %vm247_vm2, %v1523_v12 }
  0x2f   :  { %1428 = vmatmul.msk.bf16.gmra.mxu0 %vm247_vm2, %v1524_v14  ;;  %1452 = vmatmul.msk.bf16.gmra.mxu3 %vm247_vm2, %v2278_v15 }
  0x30   :  { %1460 = vmatmul.msk.bf16.gmra.mxu1 %vm247_vm2, %v1524_v14 }
  0x31   :  { %1492 = vmatmul.msk.bf16.gmra.mxu2 %vm247_vm2, %v1524_v14 }
  0x3f   :  { %1429 = vmatmul.msk.bf16.gmra.mxu0 %vm247_vm2, %v1525_v16  ;;  %1453 = vmatmul.msk.bf16.gmra.mxu3 %vm247_vm2, %v2291_v17 }
  0x40   :  { %1461 = vmatmul.msk.bf16.gmra.mxu1 %vm247_vm2, %v1525_v16 }
  0x41   :  { %1493 = vmatmul.msk.bf16.gmra.mxu2 %vm247_vm2, %v1525_v16  ;;  %v1534_v16 = vld [vmem:[%s2487_s0 + $0x60] sm:$0xff] }
  0x4f   :  { %1430 = vmatmul.msk.bf16.gmra.mxu0 %vm247_vm2, %v1526_v18  ;;  %1454 = vmatmul.msk.bf16.gmra.mxu3 %vm247_vm2, %v2304_v19 }
  0x50   :  { %1462 = vmatmul.msk.bf16.gmra.mxu1 %vm247_vm2, %v1526_v18 }
  0x51   :  { %1494 = vmatmul.msk.bf16.gmra.mxu2 %vm247_vm2, %v1526_v18 }
  0x5f   :  { %1431 = vmatmul.msk.bf16.gmra.mxu0 %vm247_vm2, %v1527_v20  ;;  %1455 = vmatmul.msk.bf16.gmra.mxu3 %vm247_vm2, %v2317_v21 }
  0x60   :  { %1463 = vmatmul.msk.bf16.gmra.mxu1 %vm247_vm2, %v1527_v20 }
  0x61   :  { %1495 = vmatmul.msk.bf16.gmra.mxu2 %vm247_vm2, %v1527_v20 }
  0x6f   :  { %1432 = vmatmul.msk.bf16.gmra.mxu0 %vm247_vm2, %v1528_v22  ;;  %1456 = vmatmul.msk.bf16.gmra.mxu3 %vm247_vm2, %v2330_v23 }
  0x70   :  { %1464 = vmatmul.msk.bf16.gmra.mxu1 %vm247_vm2, %v1528_v22 }
  0x71   :  { %1496 = vmatmul.msk.bf16.gmra.mxu2 %vm247_vm2, %v1528_v22 }
  0x7f   :  { %1433 = vmatmul.msk.bf16.gmra.mxu0 %vm247_vm2, %v1529_v24  ;;  %1457 = vmatmul.msk.bf16.gmra.mxu3 %vm247_vm2, %v2343_v25 }
  0x80   :  { %1465 = vmatmul.msk.bf16.gmra.mxu1 %vm247_vm2, %v1529_v24 }
  0x81   :  { %1497 = vmatmul.msk.bf16.gmra.mxu2 %vm247_vm2, %v1529_v24 }
  0x8c   :  { %v363_v27 = vpop.f32.mrf.mxu0 }
  0x8d   :  { %v532_v28 = vpop.f32.mrf.mxu1 }
  0x8f   :  { %1434 = vmatmul.msk.bf16.gmra.mxu0 %vm247_vm2, %v1530_v26  ;;  %1482 = vmatmul.msk.bf16.vlgmr.msrb.gmra.mxu3 %vm247_vm2, %v2252_v11 }
  0x90   :  { %1466 = vmatmul.msk.bf16.gmra.mxu1 %vm247_vm2, %v1530_v26 }
  0x91   :  { %1498 = vmatmul.msk.bf16.gmra.mxu2 %vm247_vm2, %v1530_v26 }
  0x92   :  { %v483_v29 = vpop.f32.mrf.mxu3 }
  0x94   :  { %v701_v30 = vpop.f32.mrf.mxu2  ;;  %v365_v31 = vpop.f32.mrf.mxu0 }
  0x95   :  { %v1557_v32 = vpack.c.bf16 %v365_v31, %v363_v27  ;;  %v534_v33 = vpop.f32.mrf.mxu1 }
  0x96   :  { %v1717_v34 = vpack.c.bf16 %v534_v33, %v532_v28 }
  0x97   :  { %1558 = vst [vmem:[#allocation2] sm:$0xff] %v1557_v32  }
  0x98   :  { %1718 = vst [vmem:[#allocation4] sm:$0xff] %v1717_v34   ;;  %v1535_v34 = vld [vmem:[%s2487_s0 + $0x68] sm:$0xff] }
  0x9a   :  { %v485_v35 = vpop.f32.mrf.mxu3 }
  0x9b   :  { %v1677_v36 = vpack.c.bf16 %v485_v35, %v483_v29 }
  0x9c   :  { %v703_v37 = vpop.f32.mrf.mxu2  ;;  %v368_v40 = vpop.f32.mrf.mxu0 }
  0x9d   :  { %v1877_v39 = vpack.c.bf16 %v703_v37, %v701_v30  ;;  %2057 = vst [vmem:[#allocation2 + $0xc0] sm:$0xff] %v1677_v36   ;;  %v537_v41 = vpop.f32.mrf.mxu1 }
  0x9f   :  { %1878 = vst [vmem:[#allocation6] sm:$0xff] %v1877_v39   ;;  %1435 = vmatmul.msk.bf16.gmra.mxu0 %vm247_vm2, %v1531_v38  ;;  %1483 = vmatmul.msk.bf16.gmra.mxu3 %vm247_vm2, %v2265_v13 }
  0xa0   :  { %1467 = vmatmul.msk.bf16.gmra.mxu1 %vm247_vm2, %v1531_v38 }
  0xa1   :  { %1499 = vmatmul.msk.bf16.gmra.mxu2 %vm247_vm2, %v1531_v38 }
  0xa2   :  { %v488_v42 = vpop.f32.mrf.mxu3 }
  0xa4   :  { %v706_v43 = vpop.f32.mrf.mxu2  ;;  %v370_v44 = vpop.f32.mrf.mxu0 }
  0xa5   :  { %v1562_v45 = vpack.c.bf16 %v370_v44, %v368_v40  ;;  %v539_v46 = vpop.f32.mrf.mxu1 }
  0xa6   :  { %v1722_v47 = vpack.c.bf16 %v539_v46, %v537_v41 }
  0xa7   :  { %2034 = vst [vmem:[#allocation2 + $0x8] sm:$0xff] %v1562_v45  }
  0xa8   :  { %2065 = vst [vmem:[#allocation4 + $0x8] sm:$0xff] %v1722_v47   ;;  %v1536_v47 = vld [vmem:[%s2487_s0 + $0x70] sm:$0xff] }
  0xaa   :  { %v490_v48 = vpop.f32.mrf.mxu3 }
  0xab   :  { %v1682_v49 = vpack.c.bf16 %v490_v48, %v488_v42 }
  0xac   :  { %v708_v50 = vpop.f32.mrf.mxu2  ;;  %v373_v53 = vpop.f32.mrf.mxu0 }
  0xad   :  { %v1882_v52 = vpack.c.bf16 %v708_v50, %v706_v43  ;;  %2058 = vst [vmem:[#allocation2 + $0xc8] sm:$0xff] %v1682_v49   ;;  %v542_v54 = vpop.f32.mrf.mxu1 }
  0xaf   :  { %2096 = vst [vmem:[#allocation6 + $0x8] sm:$0xff] %v1882_v52   ;;  %1436 = vmatmul.msk.bf16.gmra.mxu0 %vm247_vm2, %v1532_v51  ;;  %1484 = vmatmul.msk.bf16.gmra.mxu3 %vm247_vm2, %v2278_v15 }
  0xb0   :  { %1468 = vmatmul.msk.bf16.gmra.mxu1 %vm247_vm2, %v1532_v51 }
  0xb1   :  { %1500 = vmatmul.msk.bf16.gmra.mxu2 %vm247_vm2, %v1532_v51 }
  0xb2   :  { %v493_v55 = vpop.f32.mrf.mxu3 }
  0xb4   :  { %v711_v56 = vpop.f32.mrf.mxu2  ;;  %v375_v57 = vpop.f32.mrf.mxu0 }
  0xb5   :  { %v1567_v58 = vpack.c.bf16 %v375_v57, %v373_v53  ;;  %v544_v59 = vpop.f32.mrf.mxu1 }
  0xb6   :  { %v1727_v60 = vpack.c.bf16 %v544_v59, %v542_v54 }
  0xb7   :  { %2035 = vst [vmem:[#allocation2 + $0x10] sm:$0xff] %v1567_v58  }
  0xb8   :  { %2066 = vst [vmem:[#allocation4 + $0x10] sm:$0xff] %v1727_v60   ;;  %v1537_v60 = vld [vmem:[%s2487_s0 + $0x78] sm:$0xff] }
  0xba   :  { %v495_v61 = vpop.f32.mrf.mxu3 }
  0xbb   :  { %v1687_v62 = vpack.c.bf16 %v495_v61, %v493_v55 }
  0xbc   :  { %v713_v63 = vpop.f32.mrf.mxu2  ;;  %v378_v2 = vpop.f32.mrf.mxu0 }
  0xbd   :  { %v1887_v1 = vpack.c.bf16 %v713_v63, %v711_v56  ;;  %2059 = vst [vmem:[#allocation2 + $0xd0] sm:$0xff] %v1687_v62   ;;  %v547_v3 = vpop.f32.mrf.mxu1 }
  0xbf   :  { %2097 = vst [vmem:[#allocation6 + $0x10] sm:$0xff] %v1887_v1   ;;  %1437 = vmatmul.msk.bf16.gmra.mxu0 %vm247_vm2, %v1533_v0  ;;  %1485 = vmatmul.msk.bf16.gmra.mxu3 %vm247_vm2, %v2291_v17 }
  0xc0   :  { %1469 = vmatmul.msk.bf16.gmra.mxu1 %vm247_vm2, %v1533_v0 }
  0xc1   :  { %1501 = vmatmul.msk.bf16.gmra.mxu2 %vm247_vm2, %v1533_v0 }
  0xc2   :  { %v498_v4 = vpop.f32.mrf.mxu3 }
  0xc4   :  { %v716_v5 = vpop.f32.mrf.mxu2  ;;  %v380_v6 = vpop.f32.mrf.mxu0 }
  0xc5   :  { %v1572_v7 = vpack.c.bf16 %v380_v6, %v378_v2  ;;  %v549_v8 = vpop.f32.mrf.mxu1 }
  0xc6   :  { %v1732_v9 = vpack.c.bf16 %v549_v8, %v547_v3 }
  0xc7   :  { %2036 = vst [vmem:[#allocation2 + $0x18] sm:$0xff] %v1572_v7  }
  0xc8   :  { %2067 = vst [vmem:[#allocation4 + $0x18] sm:$0xff] %v1732_v9   ;;  %v1538_v9 = vld [vmem:[%s2487_s0 + $0x80] sm:$0xff] }
  0xca   :  { %v500_v10 = vpop.f32.mrf.mxu3 }
  0xcb   :  { %v1692_v12 = vpack.c.bf16 %v500_v10, %v498_v4 }
  0xcc   :  { %v718_v14 = vpop.f32.mrf.mxu2  ;;  %v383_v20 = vpop.f32.mrf.mxu0 }
  0xcd   :  { %v1892_v18 = vpack.c.bf16 %v718_v14, %v716_v5  ;;  %2060 = vst [vmem:[#allocation2 + $0xd8] sm:$0xff] %v1692_v12   ;;  %v552_v22 = vpop.f32.mrf.mxu1 }
  0xcf   :  { %2098 = vst [vmem:[#allocation6 + $0x18] sm:$0xff] %v1892_v18   ;;  %1438 = vmatmul.msk.bf16.gmra.mxu0 %vm247_vm2, %v1534_v16  ;;  %1486 = vmatmul.msk.bf16.gmra.mxu3 %vm247_vm2, %v2304_v19 }
  0xd0   :  { %1470 = vmatmul.msk.bf16.gmra.mxu1 %vm247_vm2, %v1534_v16 }
  0xd1   :  { %1502 = vmatmul.msk.bf16.gmra.mxu2 %vm247_vm2, %v1534_v16 }
  0xd2   :  { %v503_v24 = vpop.f32.mrf.mxu3 }
  0xd4   :  { %v721_v26 = vpop.f32.mrf.mxu2  ;;  %v385_v27 = vpop.f32.mrf.mxu0 }
  0xd5   :  { %v1577_v28 = vpack.c.bf16 %v385_v27, %v383_v20  ;;  %v554_v29 = vpop.f32.mrf.mxu1 }
  0xd6   :  { %v1737_v30 = vpack.c.bf16 %v554_v29, %v552_v22 }
  0xd7   :  { %2037 = vst [vmem:[#allocation2 + $0x20] sm:$0xff] %v1577_v28  }
  0xd8   :  { %2068 = vst [vmem:[#allocation4 + $0x20] sm:$0xff] %v1737_v30   ;;  %v1539_v30 = vld [vmem:[%s2487_s0 + $0x88] sm:$0xff] }
  0xda   :  { %v505_v31 = vpop.f32.mrf.mxu3 }
  0xdb   :  { %v1697_v32 = vpack.c.bf16 %v505_v31, %v503_v24 }
  0xdc   :  { %v723_v33 = vpop.f32.mrf.mxu2  ;;  %v388_v36 = vpop.f32.mrf.mxu0 }
  0xdd   :  { %v1897_v35 = vpack.c.bf16 %v723_v33, %v721_v26  ;;  %2061 = vst [vmem:[#allocation2 + $0xe0] sm:$0xff] %v1697_v32   ;;  %v557_v37 = vpop.f32.mrf.mxu1 }
  0xdf   :  { %2099 = vst [vmem:[#allocation6 + $0x20] sm:$0xff] %v1897_v35   ;;  %1439 = vmatmul.msk.bf16.gmra.mxu0 %vm247_vm2, %v1535_v34  ;;  %1487 = vmatmul.msk.bf16.gmra.mxu3 %vm247_vm2, %v2317_v21 }
  0xe0   :  { %1471 = vmatmul.msk.bf16.gmra.mxu1 %vm247_vm2, %v1535_v34 }
  0xe1   :  { %1503 = vmatmul.msk.bf16.gmra.mxu2 %vm247_vm2, %v1535_v34 }
  0xe2   :  { %v508_v38 = vpop.f32.mrf.mxu3 }
  0xe4   :  { %v726_v39 = vpop.f32.mrf.mxu2  ;;  %v390_v40 = vpop.f32.mrf.mxu0 }
  0xe5   :  { %v1582_v41 = vpack.c.bf16 %v390_v40, %v388_v36  ;;  %v559_v42 = vpop.f32.mrf.mxu1 }
  0xe6   :  { %v1742_v43 = vpack.c.bf16 %v559_v42, %v557_v37  ;;  %v1540_v42 = vld [vmem:[%s2487_s0 + $0x90] sm:$0xff] }
  0xe7   :  { %2038 = vst [vmem:[#allocation2 + $0x28] sm:$0xff] %v1582_v41  }
  0xe8   :  { %2069 = vst [vmem:[#allocation4 + $0x28] sm:$0xff] %v1742_v43  }
  0xea   :  { %v510_v44 = vpop.f32.mrf.mxu3 }
  0xeb   :  { %v1702_v45 = vpack.c.bf16 %v510_v44, %v508_v38 }
  0xec   :  { %v728_v46 = vpop.f32.mrf.mxu2  ;;  %v393_v49 = vpop.f32.mrf.mxu0 }
  0xed   :  { %v1902_v48 = vpack.c.bf16 %v728_v46, %v726_v39  ;;  %2062 = vst [vmem:[#allocation2 + $0xe8] sm:$0xff] %v1702_v45   ;;  %v562_v50 = vpop.f32.mrf.mxu1 }
  0xef   :  { %2100 = vst [vmem:[#allocation6 + $0x28] sm:$0xff] %v1902_v48   ;;  %1440 = vmatmul.msk.bf16.gmra.mxu0 %vm247_vm2, %v1536_v47  ;;  %1488 = vmatmul.msk.bf16.gmra.mxu3 %vm247_vm2, %v2330_v23 }
  0xf0   :  { %1472 = vmatmul.msk.bf16.gmra.mxu1 %vm247_vm2, %v1536_v47 }
  0xf1   :  { %1504 = vmatmul.msk.bf16.gmra.mxu2 %vm247_vm2, %v1536_v47 }
  0xf2   :  { %v513_v51 = vpop.f32.mrf.mxu3 }
  0xf4   :  { %v731_v52 = vpop.f32.mrf.mxu2  ;;  %v395_v53 = vpop.f32.mrf.mxu0 }
  0xf5   :  { %v1587_v54 = vpack.c.bf16 %v395_v53, %v393_v49  ;;  %v564_v55 = vpop.f32.mrf.mxu1 }
  0xf6   :  { %v1747_v56 = vpack.c.bf16 %v564_v55, %v562_v50 }
  0xf7   :  { %2039 = vst [vmem:[#allocation2 + $0x30] sm:$0xff] %v1587_v54   ;;  %v1541_v54 = vld [vmem:[%s2487_s0 + $0x98] sm:$0xff] }
  0xf8   :  { %2070 = vst [vmem:[#allocation4 + $0x30] sm:$0xff] %v1747_v56  }
  0xfa   :  { %v515_v57 = vpop.f32.mrf.mxu3 }
  0xfb   :  { %v1707_v58 = vpack.c.bf16 %v515_v57, %v513_v51 }
  0xfc   :  { %v733_v59 = vpop.f32.mrf.mxu2  ;;  %v398_v62 = vpop.f32.mrf.mxu0 }
  0xfd   :  { %v1907_v61 = vpack.c.bf16 %v733_v59, %v731_v52  ;;  %2063 = vst [vmem:[#allocation2 + $0xf0] sm:$0xff] %v1707_v58   ;;  %v567_v63 = vpop.f32.mrf.mxu1 }
  0xff   :  { %2101 = vst [vmem:[#allocation6 + $0x30] sm:$0xff] %v1907_v61   ;;  %1441 = vmatmul.msk.bf16.gmra.mxu0 %vm247_vm2, %v1537_v60  ;;  %1489 = vmatmul.msk.bf16.gmra.mxu3 %vm247_vm2, %v2343_v25 }
 0x100   :  { %1473 = vmatmul.msk.bf16.gmra.mxu1 %vm247_vm2, %v1537_v60 }
 0x101   :  { %1505 = vmatmul.msk.bf16.gmra.mxu2 %vm247_vm2, %v1537_v60 }
 0x102   :  { %v518_v0 = vpop.f32.mrf.mxu3 }
 0x104   :  { %v736_v1 = vpop.f32.mrf.mxu2  ;;  %v400_v2 = vpop.f32.mrf.mxu0 }
 0x105   :  { %v1592_v3 = vpack.c.bf16 %v400_v2, %v398_v62  ;;  %v569_v4 = vpop.f32.mrf.mxu1  ;;  %v1542_v2 = vld [vmem:[%s2487_s0 + $0xa0] sm:$0xff] }
 0x106   :  { %v1752_v5 = vpack.c.bf16 %v569_v4, %v567_v63 }
 0x107   :  { %2040 = vst [vmem:[#allocation2 + $0x38] sm:$0xff] %v1592_v3  }
 0x108   :  { %2071 = vst [vmem:[#allocation4 + $0x38] sm:$0xff] %v1752_v5  }
 0x10a   :  { %v520_v6 = vpop.f32.mrf.mxu3 }
 0x10b   :  { %v1712_v7 = vpack.c.bf16 %v520_v6, %v518_v0 }
 0x10c   :  { %v738_v8 = vpop.f32.mrf.mxu2  ;;  %v403_v12 = vpop.f32.mrf.mxu0 }
 0x10d   :  { %v1912_v10 = vpack.c.bf16 %v738_v8, %v736_v1  ;;  %2064 = vst [vmem:[#allocation2 + $0xf8] sm:$0xff] %v1712_v7   ;;  %v572_v14 = vpop.f32.mrf.mxu1 }
 0x10f   :  { %2102 = vst [vmem:[#allocation6 + $0x38] sm:$0xff] %v1912_v10   ;;  %1442 = vmatmul.msk.bf16.gmra.mxu0 %vm247_vm2, %v1538_v9  ;;  %1514 = vmatmul.msk.bf16.vlgmr.msra.gmra.mxu3 %vm247_vm2, %v2252_v11 }
 0x110   :  { %1474 = vmatmul.msk.bf16.gmra.mxu1 %vm247_vm2, %v1538_v9 }
 0x111   :  { %1506 = vmatmul.msk.bf16.gmra.mxu2 %vm247_vm2, %v1538_v9 }
 0x112   :  { %v652_v16 = vpop.f32.mrf.mxu3 }
 0x114   :  { %v741_v18 = vpop.f32.mrf.mxu2  ;;  %v405_v20 = vpop.f32.mrf.mxu0 }
 0x115   :  { %v1597_v22 = vpack.c.bf16 %v405_v20, %v403_v12  ;;  %v574_v24 = vpop.f32.mrf.mxu1 }
 0x116   :  { %v1757_v26 = vpack.c.bf16 %v574_v24, %v572_v14 }
 0x117   :  { %2041 = vst [vmem:[#allocation2 + $0x40] sm:$0xff] %v1597_v22  }
 0x118   :  { %2072 = vst [vmem:[#allocation4 + $0x40] sm:$0xff] %v1757_v26  }
 0x11a   :  { %v654_v27 = vpop.f32.mrf.mxu3 }
 0x11b   :  { %v1837_v28 = vpack.c.bf16 %v654_v27, %v652_v16 }
 0x11c   :  { %v743_v29 = vpop.f32.mrf.mxu2  ;;  %v408_v31 = vpop.f32.mrf.mxu0 }
 0x11d   :  { %v1917_v11 = vpack.c.bf16 %v743_v29, %v741_v18  ;;  %2088 = vst [vmem:[#allocation4 + $0xc0] sm:$0xff] %v1837_v28   ;;  %v577_v32 = vpop.f32.mrf.mxu1  ;;  %v1543_v18 = vld [vmem:[%s2487_s0 + $0xa8] sm:$0xff] }
 0x11f   :  { %2103 = vst [vmem:[#allocation6 + $0x40] sm:$0xff] %v1917_v11   ;;  %1443 = vmatmul.msk.bf16.gmra.mxu0 %vm247_vm2, %v1539_v30  ;;  %1515 = vmatmul.msk.bf16.gmra.mxu3 %vm247_vm2, %v2265_v13 }
 0x120   :  { %1475 = vmatmul.msk.bf16.gmra.mxu1 %vm247_vm2, %v1539_v30 }
 0x121   :  { %1507 = vmatmul.msk.bf16.gmra.mxu2 %vm247_vm2, %v1539_v30 }
 0x122   :  { %v657_v33 = vpop.f32.mrf.mxu3 }
 0x124   :  { %v746_v34 = vpop.f32.mrf.mxu2  ;;  %v410_v35 = vpop.f32.mrf.mxu0 }
 0x125   :  { %v1602_v36 = vpack.c.bf16 %v410_v35, %v408_v31  ;;  %v579_v37 = vpop.f32.mrf.mxu1 }
 0x126   :  { %v1762_v38 = vpack.c.bf16 %v579_v37, %v577_v32 }
 0x127   :  { %2042 = vst [vmem:[#allocation2 + $0x48] sm:$0xff] %v1602_v36  }
 0x128   :  { %2073 = vst [vmem:[#allocation4 + $0x48] sm:$0xff] %v1762_v38  }
 0x12a   :  { %v659_v39 = vpop.f32.mrf.mxu3 }
 0x12b   :  { %v1842_v40 = vpack.c.bf16 %v659_v39, %v657_v33  ;;  %v1544_v33 = vld [vmem:[%s2487_s0 + $0xb0] sm:$0xff] }
 0x12c   :  { %v748_v41 = vpop.f32.mrf.mxu2  ;;  %v413_v43 = vpop.f32.mrf.mxu0 }
 0x12d   :  { %v1922_v13 = vpack.c.bf16 %v748_v41, %v746_v34  ;;  %2089 = vst [vmem:[#allocation4 + $0xc8] sm:$0xff] %v1842_v40   ;;  %v582_v44 = vpop.f32.mrf.mxu1 }
 0x12f   :  { %2104 = vst [vmem:[#allocation6 + $0x48] sm:$0xff] %v1922_v13   ;;  %1444 = vmatmul.msk.bf16.gmra.mxu0 %vm247_vm2, %v1540_v42  ;;  %1516 = vmatmul.msk.bf16.gmra.mxu3 %vm247_vm2, %v2278_v15 }
 0x130   :  { %1476 = vmatmul.msk.bf16.gmra.mxu1 %vm247_vm2, %v1540_v42 }
 0x131   :  { %1508 = vmatmul.msk.bf16.gmra.mxu2 %vm247_vm2, %v1540_v42 }
 0x132   :  { %v662_v45 = vpop.f32.mrf.mxu3 }
 0x134   :  { %v751_v46 = vpop.f32.mrf.mxu2  ;;  %v415_v47 = vpop.f32.mrf.mxu0 }
 0x135   :  { %v1607_v48 = vpack.c.bf16 %v415_v47, %v413_v43  ;;  %v584_v49 = vpop.f32.mrf.mxu1 }
 0x136   :  { %v1767_v50 = vpack.c.bf16 %v584_v49, %v582_v44  ;;  %v1545_v44 = vld [vmem:[%s2487_s0 + $0xb8] sm:$0xff]  ;;  %s2213_s0 = smov [#allocation4]  }
 0x137   :  { %2043 = vst [vmem:[#allocation2 + $0x50] sm:$0xff] %v1607_v48   ;;  %s1262_s26 = sshll.u32 %s2213_s0, 4  ;;  %s1263_s26 = int_to_ptr.vmem [resolvable:$true] %s1262_s26 }
 0x138   :  { %2074 = vst [vmem:[#allocation4 + $0x50] sm:$0xff] %v1767_v50  }
 0x13a   :  { %v664_v51 = vpop.f32.mrf.mxu3 }
 0x13b   :  { %v1847_v52 = vpack.c.bf16 %v664_v51, %v662_v45 }
 0x13c   :  { %v753_v53 = vpop.f32.mrf.mxu2  ;;  %v418_v55 = vpop.f32.mrf.mxu0 }
 0x13d   :  { %v1927_v15 = vpack.c.bf16 %v753_v53, %v751_v46  ;;  %2090 = vst [vmem:[#allocation4 + $0xd0] sm:$0xff] %v1847_v52   ;;  %v587_v56 = vpop.f32.mrf.mxu1 }
 0x13f   :  { %2105 = vst [vmem:[#allocation6 + $0x50] sm:$0xff] %v1927_v15   ;;  %1445 = vmatmul.msk.bf16.gmra.mxu0 %vm247_vm2, %v1541_v54  ;;  %1517 = vmatmul.msk.bf16.gmra.mxu3 %vm247_vm2, %v2291_v17 }
 0x140   :  { %1477 = vmatmul.msk.bf16.gmra.mxu1 %vm247_vm2, %v1541_v54 }
 0x141   :  { %1509 = vmatmul.msk.bf16.gmra.mxu2 %vm247_vm2, %v1541_v54 }
 0x142   :  { %v667_v57 = vpop.f32.mrf.mxu3 }
 0x144   :  { %v756_v58 = vpop.f32.mrf.mxu2  ;;  %v420_v59 = vpop.f32.mrf.mxu0 }
 0x145   :  { %v1612_v60 = vpack.c.bf16 %v420_v59, %v418_v55  ;;  %v589_v61 = vpop.f32.mrf.mxu1 }
 0x146   :  { %v1772_v62 = vpack.c.bf16 %v589_v61, %v587_v56 }
 0x147   :  { %2044 = vst [vmem:[#allocation2 + $0x58] sm:$0xff] %v1612_v60  }
 0x148   :  { %2075 = vst [vmem:[#allocation4 + $0x58] sm:$0xff] %v1772_v62  }
 0x14a   :  { %v669_v63 = vpop.f32.mrf.mxu3 }
 0x14b   :  { %v1852_v0 = vpack.c.bf16 %v669_v63, %v667_v57 }
 0x14c   :  { %v758_v1 = vpop.f32.mrf.mxu2  ;;  %v423_v3 = vpop.f32.mrf.mxu0 }
 0x14d   :  { %v1932_v17 = vpack.c.bf16 %v758_v1, %v756_v58  ;;  %2091 = vst [vmem:[#allocation4 + $0xd8] sm:$0xff] %v1852_v0   ;;  %v592_v4 = vpop.f32.mrf.mxu1 }
 0x14f   :  { %2106 = vst [vmem:[#allocation6 + $0x58] sm:$0xff] %v1932_v17   ;;  %1446 = vmatmul.msk.bf16.gmra.mxu0 %vm247_vm2, %v1542_v2  ;;  %1518 = vmatmul.msk.bf16.gmra.mxu3 %vm247_vm2, %v2304_v19 }
 0x150   :  { %1478 = vmatmul.msk.bf16.gmra.mxu1 %vm247_vm2, %v1542_v2 }
 0x151   :  { %1510 = vmatmul.msk.bf16.gmra.mxu2 %vm247_vm2, %v1542_v2 }
 0x152   :  { %v672_v5 = vpop.f32.mrf.mxu3 }
 0x154   :  { %v761_v6 = vpop.f32.mrf.mxu2  ;;  %v425_v7 = vpop.f32.mrf.mxu0 }
 0x155   :  { %v1617_v8 = vpack.c.bf16 %v425_v7, %v423_v3  ;;  %v594_v9 = vpop.f32.mrf.mxu1 }
 0x156   :  { %v1777_v10 = vpack.c.bf16 %v594_v9, %v592_v4 }
 0x157   :  { %2045 = vst [vmem:[#allocation2 + $0x60] sm:$0xff] %v1617_v8  }
 0x158   :  { %2076 = vst [vmem:[#allocation4 + $0x60] sm:$0xff] %v1777_v10  }
 0x15a   :  { %v674_v12 = vpop.f32.mrf.mxu3 }
 0x15b   :  { %v1857_v14 = vpack.c.bf16 %v674_v12, %v672_v5 }
 0x15c   :  { %v763_v16 = vpop.f32.mrf.mxu2  ;;  %v428_v20 = vpop.f32.mrf.mxu0 }
 0x15d   :  { %v1937_v19 = vpack.c.bf16 %v763_v16, %v761_v6  ;;  %2092 = vst [vmem:[#allocation4 + $0xe0] sm:$0xff] %v1857_v14   ;;  %v597_v22 = vpop.f32.mrf.mxu1 }
 0x15f   :  { %2107 = vst [vmem:[#allocation6 + $0x60] sm:$0xff] %v1937_v19   ;;  %1447 = vmatmul.msk.bf16.gmra.mxu0 %vm247_vm2, %v1543_v18  ;;  %1519 = vmatmul.msk.bf16.gmra.mxu3 %vm247_vm2, %v2317_v21 }
 0x160   :  { %1479 = vmatmul.msk.bf16.gmra.mxu1 %vm247_vm2, %v1543_v18 }
 0x161   :  { %1511 = vmatmul.msk.bf16.gmra.mxu2 %vm247_vm2, %v1543_v18 }
 0x162   :  { %v677_v24 = vpop.f32.mrf.mxu3 }
 0x164   :  { %v766_v26 = vpop.f32.mrf.mxu2  ;;  %v430_v27 = vpop.f32.mrf.mxu0 }
 0x165   :  { %v1622_v28 = vpack.c.bf16 %v430_v27, %v428_v20  ;;  %v599_v29 = vpop.f32.mrf.mxu1 }
 0x166   :  { %v1782_v30 = vpack.c.bf16 %v599_v29, %v597_v22 }
 0x167   :  { %2046 = vst [vmem:[#allocation2 + $0x68] sm:$0xff] %v1622_v28  }
 0x168   :  { %2077 = vst [vmem:[#allocation4 + $0x68] sm:$0xff] %v1782_v30  }
 0x16a   :  { %v679_v11 = vpop.f32.mrf.mxu3 }
 0x16b   :  { %v1862_v31 = vpack.c.bf16 %v679_v11, %v677_v24 }
 0x16c   :  { %v768_v32 = vpop.f32.mrf.mxu2  ;;  %v433_v34 = vpop.f32.mrf.mxu0 }
 0x16d   :  { %v1942_v21 = vpack.c.bf16 %v768_v32, %v766_v26  ;;  %2093 = vst [vmem:[#allocation4 + $0xe8] sm:$0xff] %v1862_v31   ;;  %v602_v35 = vpop.f32.mrf.mxu1 }
 0x16f   :  { %2108 = vst [vmem:[#allocation6 + $0x68] sm:$0xff] %v1942_v21   ;;  %1448 = vmatmul.msk.bf16.gmra.mxu0 %vm247_vm2, %v1544_v33  ;;  %1520 = vmatmul.msk.bf16.gmra.mxu3 %vm247_vm2, %v2330_v23 }
 0x170   :  { %1480 = vmatmul.msk.bf16.gmra.mxu1 %vm247_vm2, %v1544_v33 }
 0x171   :  { %1512 = vmatmul.msk.bf16.gmra.mxu2 %vm247_vm2, %v1544_v33 }
 0x172   :  { %v682_v36 = vpop.f32.mrf.mxu3 }
 0x174   :  { %v771_v37 = vpop.f32.mrf.mxu2  ;;  %v435_v38 = vpop.f32.mrf.mxu0 }
 0x175   :  { %v1627_v39 = vpack.c.bf16 %v435_v38, %v433_v34  ;;  %v604_v40 = vpop.f32.mrf.mxu1 }
 0x176   :  { %v1787_v41 = vpack.c.bf16 %v604_v40, %v602_v35 }
 0x177   :  { %2047 = vst [vmem:[#allocation2 + $0x70] sm:$0xff] %v1627_v39  }
 0x178   :  { %2078 = vst [vmem:[#allocation4 + $0x70] sm:$0xff] %v1787_v41  }
 0x17a   :  { %v684_v42 = vpop.f32.mrf.mxu3 }
 0x17b   :  { %v1867_v13 = vpack.c.bf16 %v684_v42, %v682_v36 }
 0x17c   :  { %v773_v43 = vpop.f32.mrf.mxu2  ;;  %v438_v45 = vpop.f32.mrf.mxu0 }
 0x17d   :  { %v1947_v23 = vpack.c.bf16 %v773_v43, %v771_v37  ;;  %2094 = vst [vmem:[#allocation4 + $0xf0] sm:$0xff] %v1867_v13   ;;  %v607_v46 = vpop.f32.mrf.mxu1 }
 0x17f   :  { %2109 = vst [vmem:[#allocation6 + $0x70] sm:$0xff] %v1947_v23   ;;  %1449 = vmatmul.msk.bf16.gmra.mxu0 %vm247_vm2, %v1545_v44  ;;  %1521 = vmatmul.msk.bf16.gmra.mxu3 %vm247_vm2, %v2343_v25 }
 0x180   :  { %1481 = vmatmul.msk.bf16.gmra.mxu1 %vm247_vm2, %v1545_v44 }
 0x181   :  { %1513 = vmatmul.msk.bf16.gmra.mxu2 %vm247_vm2, %v1545_v44 }
 0x182   :  { %v687_v47 = vpop.f32.mrf.mxu3 }
 0x184   :  { %v776_v48 = vpop.f32.mrf.mxu2  ;;  %v440_v49 = vpop.f32.mrf.mxu0 }
 0x185   :  { %v1632_v50 = vpack.c.bf16 %v440_v49, %v438_v45  ;;  %v609_v51 = vpop.f32.mrf.mxu1 }
 0x186   :  { %v1792_v52 = vpack.c.bf16 %v609_v51, %v607_v46 }
 0x187   :  { %2048 = vst [vmem:[#allocation2 + $0x78] sm:$0xff] %v1632_v50  }
 0x188   :  { %2079 = vst [vmem:[#allocation4 + $0x78] sm:$0xff] %v1792_v52  }
 0x18a   :  { %v689_v53 = vpop.f32.mrf.mxu3 }
 0x18b   :  { %v1872_v54 = vpack.c.bf16 %v689_v53, %v687_v47 }
 0x18c   :  { %v778_v15 = vpop.f32.mrf.mxu2  ;;  %v443_v56 = vpop.f32.mrf.mxu0 }
 0x18d   :  { %v1952_v55 = vpack.c.bf16 %v778_v15, %v776_v48  ;;  %2095 = vst [vmem:[#allocation4 + $0xf8] sm:$0xff] %v1872_v54   ;;  %v612_v57 = vpop.f32.mrf.mxu1 }
 0x18f   :  { %2110 = vst [vmem:[#allocation6 + $0x78] sm:$0xff] %v1952_v55  }
 0x192   :  { %v821_v25 = vpop.f32.mrf.mxu3 }
 0x194   :  { %v781_v58 = vpop.f32.mrf.mxu2  ;;  %v445_v59 = vpop.f32.mrf.mxu0 }
 0x195   :  { %v1637_v60 = vpack.c.bf16 %v445_v59, %v443_v56  ;;  %v614_v61 = vpop.f32.mrf.mxu1 }
 0x196   :  { %v1797_v62 = vpack.c.bf16 %v614_v61, %v612_v57 }
 0x197   :  { %2049 = vst [vmem:[#allocation2 + $0x80] sm:$0xff] %v1637_v60  }
 0x198   :  { %2080 = vst [vmem:[#allocation4 + $0x80] sm:$0xff] %v1797_v62  }
 0x19a   :  { %v823_v63 = vpop.f32.mrf.mxu3 }
 0x19b   :  { %v1997_v1 = vpack.c.bf16 %v823_v63, %v821_v25 }
 0x19c   :  { %v783_v0 = vpop.f32.mrf.mxu2  ;;  %v448_v17 = vpop.f32.mrf.mxu0 }
 0x19d   :  { %v1957_v2 = vpack.c.bf16 %v783_v0, %v781_v58  ;;  %2119 = vst [vmem:[#allocation6 + $0xc0] sm:$0xff] %v1997_v1   ;;  %v617_v3 = vpop.f32.mrf.mxu1 }
 0x19f   :  { %2111 = vst [vmem:[#allocation6 + $0x80] sm:$0xff] %v1957_v2  }
 0x1a2   :  { %v826_v4 = vpop.f32.mrf.mxu3 }
 0x1a4   :  { %v786_v5 = vpop.f32.mrf.mxu2  ;;  %v450_v6 = vpop.f32.mrf.mxu0 }
 0x1a5   :  { %v1642_v7 = vpack.c.bf16 %v450_v6, %v448_v17  ;;  %v619_v8 = vpop.f32.mrf.mxu1 }
 0x1a6   :  { %v1802_v9 = vpack.c.bf16 %v619_v8, %v617_v3 }
 0x1a7   :  { %2050 = vst [vmem:[#allocation2 + $0x88] sm:$0xff] %v1642_v7  }
 0x1a8   :  { %2081 = vst [vmem:[#allocation4 + $0x88] sm:$0xff] %v1802_v9  }
 0x1aa   :  { %v828_v10 = vpop.f32.mrf.mxu3 }
 0x1ab   :  { %v2002_v14 = vpack.c.bf16 %v828_v10, %v826_v4 }
 0x1ac   :  { %v788_v12 = vpop.f32.mrf.mxu2  ;;  %v453_v18 = vpop.f32.mrf.mxu0 }
 0x1ad   :  { %v1962_v16 = vpack.c.bf16 %v788_v12, %v786_v5  ;;  %2120 = vst [vmem:[#allocation6 + $0xc8] sm:$0xff] %v2002_v14   ;;  %v622_v19 = vpop.f32.mrf.mxu1 }
 0x1af   :  { %2112 = vst [vmem:[#allocation6 + $0x88] sm:$0xff] %v1962_v16  }
 0x1b2   :  { %v831_v20 = vpop.f32.mrf.mxu3 }
 0x1b4   :  { %v791_v22 = vpop.f32.mrf.mxu2  ;;  %v455_v24 = vpop.f32.mrf.mxu0 }
 0x1b5   :  { %v1647_v26 = vpack.c.bf16 %v455_v24, %v453_v18  ;;  %v624_v27 = vpop.f32.mrf.mxu1 }
 0x1b6   :  { %v1807_v28 = vpack.c.bf16 %v624_v27, %v622_v19 }
 0x1b7   :  { %2051 = vst [vmem:[#allocation2 + $0x90] sm:$0xff] %v1647_v26  }
 0x1b8   :  { %2082 = vst [vmem:[#allocation4 + $0x90] sm:$0xff] %v1807_v28  }
 0x1ba   :  { %v833_v29 = vpop.f32.mrf.mxu3 }
 0x1bb   :  { %v2007_v11 = vpack.c.bf16 %v833_v29, %v831_v20 }
 0x1bc   :  { %v793_v30 = vpop.f32.mrf.mxu2  ;;  %v458_v32 = vpop.f32.mrf.mxu0 }
 0x1bd   :  { %v1967_v31 = vpack.c.bf16 %v793_v30, %v791_v22  ;;  %2121 = vst [vmem:[#allocation6 + $0xd0] sm:$0xff] %v2007_v11   ;;  %v627_v33 = vpop.f32.mrf.mxu1 }
 0x1bf   :  { %2113 = vst [vmem:[#allocation6 + $0x90] sm:$0xff] %v1967_v31  }
 0x1c2   :  { %v836_v21 = vpop.f32.mrf.mxu3 }
 0x1c4   :  { %v796_v34 = vpop.f32.mrf.mxu2  ;;  %v460_v35 = vpop.f32.mrf.mxu0 }
 0x1c5   :  { %v1652_v36 = vpack.c.bf16 %v460_v35, %v458_v32  ;;  %v629_v37 = vpop.f32.mrf.mxu1 }
 0x1c6   :  { %v1812_v38 = vpack.c.bf16 %v629_v37, %v627_v33 }
 0x1c7   :  { %2052 = vst [vmem:[#allocation2 + $0x98] sm:$0xff] %v1652_v36  }
 0x1c8   :  { %2083 = vst [vmem:[#allocation4 + $0x98] sm:$0xff] %v1812_v38  }
 0x1ca   :  { %v838_v39 = vpop.f32.mrf.mxu3 }
 0x1cb   :  { %v2012_v41 = vpack.c.bf16 %v838_v39, %v836_v21 }
 0x1cc   :  { %v798_v40 = vpop.f32.mrf.mxu2  ;;  %v463_v13 = vpop.f32.mrf.mxu0 }
 0x1cd   :  { %v1972_v42 = vpack.c.bf16 %v798_v40, %v796_v34  ;;  %2122 = vst [vmem:[#allocation6 + $0xd8] sm:$0xff] %v2012_v41   ;;  %v632_v43 = vpop.f32.mrf.mxu1 }
 0x1cf   :  { %2114 = vst [vmem:[#allocation6 + $0x98] sm:$0xff] %v1972_v42  }
 0x1d2   :  { %v841_v44 = vpop.f32.mrf.mxu3 }
 0x1d4   :  { %v801_v23 = vpop.f32.mrf.mxu2  ;;  %v465_v45 = vpop.f32.mrf.mxu0 }
 0x1d5   :  { %v1657_v46 = vpack.c.bf16 %v465_v45, %v463_v13  ;;  %v634_v47 = vpop.f32.mrf.mxu1 }
 0x1d6   :  { %v1817_v48 = vpack.c.bf16 %v634_v47, %v632_v43 }
 0x1d7   :  { %2053 = vst [vmem:[#allocation2 + $0xa0] sm:$0xff] %v1657_v46  }
 0x1d8   :  { %2084 = vst [vmem:[#allocation4 + $0xa0] sm:$0xff] %v1817_v48  }
 0x1da   :  { %v843_v49 = vpop.f32.mrf.mxu3 }
 0x1db   :  { %v2017_v51 = vpack.c.bf16 %v843_v49, %v841_v44 }
 0x1dc   :  { %v803_v50 = vpop.f32.mrf.mxu2  ;;  %v468_v53 = vpop.f32.mrf.mxu0 }
 0x1dd   :  { %v1977_v52 = vpack.c.bf16 %v803_v50, %v801_v23  ;;  %2123 = vst [vmem:[#allocation6 + $0xe0] sm:$0xff] %v2017_v51   ;;  %v637_v54 = vpop.f32.mrf.mxu1 }
 0x1df   :  { %2115 = vst [vmem:[#allocation6 + $0xa0] sm:$0xff] %v1977_v52  }
 0x1e2   :  { %v846_v15 = vpop.f32.mrf.mxu3 }
 0x1e4   :  { %v806_v55 = vpop.f32.mrf.mxu2  ;;  %v470_v56 = vpop.f32.mrf.mxu0 }
 0x1e5   :  { %v1662_v57 = vpack.c.bf16 %v470_v56, %v468_v53  ;;  %v639_v25 = vpop.f32.mrf.mxu1 }
 0x1e6   :  { %v1822_v58 = vpack.c.bf16 %v639_v25, %v637_v54 }
 0x1e7   :  { %2054 = vst [vmem:[#allocation2 + $0xa8] sm:$0xff] %v1662_v57  }
 0x1e8   :  { %2085 = vst [vmem:[#allocation4 + $0xa8] sm:$0xff] %v1822_v58  }
 0x1ea   :  { %v848_v59 = vpop.f32.mrf.mxu3 }
 0x1eb   :  { %v2022_v61 = vpack.c.bf16 %v848_v59, %v846_v15 }
 0x1ec   :  { %v808_v60 = vpop.f32.mrf.mxu2  ;;  %v473_v63 = vpop.f32.mrf.mxu0 }
 0x1ed   :  { %v1982_v62 = vpack.c.bf16 %v808_v60, %v806_v55  ;;  %2124 = vst [vmem:[#allocation6 + $0xe8] sm:$0xff] %v2022_v61   ;;  %v642_v0 = vpop.f32.mrf.mxu1 }
 0x1ef   :  { %2116 = vst [vmem:[#allocation6 + $0xa8] sm:$0xff] %v1982_v62  }
 0x1f2   :  { %v851_v1 = vpop.f32.mrf.mxu3 }
 0x1f4   :  { %v811_v2 = vpop.f32.mrf.mxu2  ;;  %v475_v17 = vpop.f32.mrf.mxu0 }
 0x1f5   :  { %v1667_v3 = vpack.c.bf16 %v475_v17, %v473_v63  ;;  %v644_v4 = vpop.f32.mrf.mxu1 }
 0x1f6   :  { %v1827_v5 = vpack.c.bf16 %v644_v4, %v642_v0 }
 0x1f7   :  { %2055 = vst [vmem:[#allocation2 + $0xb0] sm:$0xff] %v1667_v3  }
 0x1f8   :  { %2086 = vst [vmem:[#allocation4 + $0xb0] sm:$0xff] %v1827_v5  }
 0x1fa   :  { %v853_v6 = vpop.f32.mrf.mxu3 }
 0x1fb   :  { %v2027_v8 = vpack.c.bf16 %v853_v6, %v851_v1 }
 0x1fc   :  { %v813_v7 = vpop.f32.mrf.mxu2  ;;  %v478_v10 = vpop.f32.mrf.mxu0 }
 0x1fd   :  { %v1987_v9 = vpack.c.bf16 %v813_v7, %v811_v2  ;;  %2125 = vst [vmem:[#allocation6 + $0xf0] sm:$0xff] %v2027_v8   ;;  %v647_v12 = vpop.f32.mrf.mxu1 }
 0x1ff   :  { %2117 = vst [vmem:[#allocation6 + $0xb0] sm:$0xff] %v1987_v9  }
 0x202   :  { %v856_v14 = vpop.f32.mrf.mxu3 }
 0x204   :  { %v816_v16 = vpop.f32.mrf.mxu2  ;;  %v480_v18 = vpop.f32.mrf.mxu0 }
 0x205   :  { %v1672_v19 = vpack.c.bf16 %v480_v18, %v478_v10  ;;  %v649_v20 = vpop.f32.mrf.mxu1 }
 0x206   :  { %v1832_v22 = vpack.c.bf16 %v649_v20, %v647_v12 }
 0x207   :  { %2056 = vst [vmem:[#allocation2 + $0xb8] sm:$0xff] %v1672_v19  }
 0x208   :  { %2087 = vst [vmem:[#allocation4 + $0xb8] sm:$0xff] %v1832_v22   ;;  %1257 = dma.vmem_to_hbm [thread:$0]  %s1250_s28, 4096, %s1252_s5, [#allocation3], %s2216_s13, %s2216_s13, %s2217_s14  }
 0x209   :  { %1270 = dma.vmem_to_hbm [thread:$0]  %s1263_s26, 4096, %s1265_s8, [#allocation5], %s2216_s13, %s2216_s13, %s2217_s14  }
 0x20a   :  { %v858_v24 = vpop.f32.mrf.mxu3 }
 0x20b   :  { %v2032_v27 = vpack.c.bf16 %v858_v24, %v856_v14 }
 0x20c   :  { %v818_v26 = vpop.f32.mrf.mxu2 }
 0x20d   :  { %v1992_v28 = vpack.c.bf16 %v818_v26, %v816_v16  ;;  %2126 = vst [vmem:[#allocation6 + $0xf8] sm:$0xff] %v2032_v27  }
 0x20f   :  { %2118 = vst [vmem:[#allocation6 + $0xb8] sm:$0xff] %v1992_v28  }
 0x210   :  { %1283 = dma.vmem_to_hbm [thread:$0]  %s1276_s10, 4096, %s1278_s2, [#allocation5], %s2216_s13, %s2216_s13, %s2217_s14  }
 0x211   :  { %2208 = dma.done.wait [#allocation3], 4096  }
 0x212   :  { %2209 = vsyncadd [#allocation3], 4294963200 }
 0x213   :  { %2210 = dma.done.wait [#allocation5], 8192  }
 0x214   :  { %2211 = vsyncadd [#allocation5], 4294959104 }
 0x215   :  { %1296 = vsyncpa [#allocation3], 1 }
 0x216   :  { %1297 = vsyncpa [#allocation5], 1 }

</bundles_post_ra>
